<compile_context>
chip_gen: v7x
topology: tpu7x:2x2x1
jax: 0.10.0
libtpu: 0.0.40
codegen_flags: <defaults>
</compile_context>

<pallas_src>
import jax
import jax.numpy as jnp
from jax import lax
from jax.experimental import pallas as pl
from jax.experimental.pallas import tpu as pltpu


# x @ w.T with w stored in PyTorch nn.Linear layout (out_features, in_features)
_NT_DIMS = (((1,), (1,)), ((), ()))


# ---------------- fused Pallas kernel ----------------

def _gcn_fused_kernel(adj_ref, x_ref, w1_ref, w2_ref, w3_ref, o_ref):
    """All three GCN layers for all (node, batch, step) rows at once.

    adj_ref: (N*BT, N*BT)   kron(adj, I_BT)  -> adjacency aggregation as one 2-D matmul
    x_ref  : (N*BT, Fin)
    w1_ref : (2F, F)        w2_ref: (F//2, 2F)        w3_ref: (F_PAD, F//2)
    o_ref  : (N*BT, F_PAD)
    """
    adj = adj_ref[...].astype(jnp.float32)
    w1 = w1_ref[...].astype(jnp.float32)
    w2 = w2_ref[...].astype(jnp.float32)
    w3 = w3_ref[...].astype(jnp.float32)
    h = x_ref[...].astype(jnp.float32)

    def layer(h, w, relu):
        # aggregate over nodes (per (b, t) column) ...
        h = jnp.dot(adj, h, preferred_element_type=jnp.float32)
        # ... then Linear: h @ w.T  (w in PyTorch (out, in) layout)
        h = lax.dot_general(h, w, _NT_DIMS, preferred_element_type=jnp.float32)
        return jnp.maximum(h, 0.0) if relu else h

    h = layer(h, w1, True)
    h = layer(h, w2, True)
    y = layer(h, w3, False)            # (N*BT, F_PAD); padded rows of w3 are zero
    o_ref[...] = y.astype(o_ref.dtype)


@jax.jit
def gcn_forward(features, adj, w1, w2, w3):
    """features: (N, B, T, Fin), adj: (N, N), weights in PyTorch (out, in) layout."""
    N, B, T, f_in = features.shape
    out_dim = w3.shape[0]
    bt = B * T
    nbt = N * bt
    f_pad = max(128, ((out_dim + 127) // 128) * 128)

    # Lane-dense padded fc3 weight (extra rows are zero; sliced off below).
    w3_pad = jnp.zeros((f_pad, w3.shape[1]), w3.dtype).at[:out_dim].set(w3)

    # Adjacency applied to the flattened (node, column) axis: kron(adj, I_bt).
    # Tiny ((N*BT)^2 * 4B ~ 16 KiB here); lets every kernel matmul be a plain 2-D MXU op.
    adj_big = jnp.kron(adj, jnp.eye(bt, dtype=adj.dtype))

    # Free contiguous view, no transpose: row index = n*BT + b*T + t.
    x_flat = features.reshape(nbt, f_in)

    out = pl.pallas_call(
        _gcn_fused_kernel,
        out_shape=jax.ShapeDtypeStruct((nbt, f_pad), features.dtype),
        grid=(1,),
        in_specs=[
            pl.BlockSpec((nbt, nbt), lambda q: (0, 0)),        # adj_big: VMEM-resident
            pl.BlockSpec((nbt, f_in), lambda q: (0, 0)),        # activations
            pl.BlockSpec(w1.shape, lambda q: (0, 0)),           # weights: VMEM-resident
            pl.BlockSpec(w2.shape, lambda q: (0, 0)),
            pl.BlockSpec((f_pad, w3.shape[1]), lambda q: (0, 0)),
        ],
        out_specs=pl.BlockSpec((nbt, f_pad), lambda q: (0, 0)),
        compiler_params=pltpu.CompilerParams(
            dimension_semantics=("arbitrary",),
        ),
    )(adj_big, x_flat, w1, w2, w3_pad)

    # (N*B*T, F_PAD) -> slice padding, free reshape back to (N, B, T, out_dim).
    return out[:, :out_dim].reshape(N, B, T, out_dim)


# ---------------- params / reference ----------------

def init_gcn_params(key, in_dim, out_dim=7):
    """Weights in PyTorch nn.Linear layout: (out_features, in_features), no bias."""
    k1, k2, k3 = jax.random.split(key, 3)
    h1, h2 = in_dim * 2, in_dim // 2
    w1 = jax.random.normal(k1, (h1, in_dim), jnp.float32) * (1.0 / jnp.sqrt(in_dim))
    w2 = jax.random.normal(k2, (h2, h1), jnp.float32) * (1.0 / jnp.sqrt(h1))
    w3 = jax.random.normal(k3, (out_dim, h2), jnp.float32) * (1.0 / jnp.sqrt(h2))
    return w1, w2, w3


def gcn_reference(features, adj, w1, w2, w3):
    def layer(x, w, relu):
        x = jnp.einsum('ij,jklm->iklm', adj, x)
        x = jnp.einsum('iklm,om->iklo', x, w)
        return jnp.maximum(x, 0.0) if relu else x
    x = layer(features, w1, True)
    x = layer(x, w2, True)
    return layer(x, w3, False)


if __name__ == "__main__":
    key = jax.random.PRNGKey(0)
    k_feat, k_adj, k_params = jax.random.split(key, 3)

    num_nodes, batch, steps, in_dim, out_dim = 8, 2, 4, 16, 7
    features = jax.random.normal(k_feat, (num_nodes, batch, steps, in_dim), jnp.float32)
    adj = jax.random.uniform(k_adj, (num_nodes, num_nodes), jnp.float32)

    w1, w2, w3 = init_gcn_params(k_params, in_dim, out_dim)

    out = gcn_forward(features, adj, w1, w2, w3)
    out = jax.block_until_ready(out)

    ref = gcn_reference(features, adj, w1, w2, w3)
    assert out.shape == (num_nodes, batch, steps, out_dim)
    assert jnp.allclose(out, ref, atol=1e-4, rtol=1e-4)

    print("KERNEL_OK")
</pallas_src>

<mosaic_0001>
module attributes {stable_mosaic.version = 11 : i64} {
  func.func @_gcn_fused_kernel(%arg0: i32, %arg1: memref<64x64xf32, #tpu.memory_space<vmem>>, %arg2: memref<64x16xf32, #tpu.memory_space<vmem>>, %arg3: memref<32x16xf32, #tpu.memory_space<vmem>>, %arg4: memref<8x32xf32, #tpu.memory_space<vmem>>, %arg5: memref<128x8xf32, #tpu.memory_space<vmem>>, %arg6: memref<64x128xf32, #tpu.memory_space<vmem>>) attributes {dimension_semantics = [#tpu.dimension_semantics<arbitrary>], iteration_bounds = array<i64: 1>, scalar_prefetch = 0 : i64, scratch_operands = 0 : i64, tpu.core_type = #tpu.core_type<tc>, window_params = [{pipeline_mode = #tpu.pipeline_mode<synchronous>, transform_indices = @transform_0, window_bounds = array<i64: 64, 64>}, {pipeline_mode = #tpu.pipeline_mode<synchronous>, transform_indices = @transform_1, window_bounds = array<i64: 64, 16>}, {pipeline_mode = #tpu.pipeline_mode<synchronous>, transform_indices = @transform_2, window_bounds = array<i64: 32, 16>}, {pipeline_mode = #tpu.pipeline_mode<synchronous>, transform_indices = @transform_3, window_bounds = array<i64: 8, 32>}, {pipeline_mode = #tpu.pipeline_mode<synchronous>, transform_indices = @transform_4, window_bounds = array<i64: 128, 8>}, {pipeline_mode = #tpu.pipeline_mode<synchronous>, transform_indices = @transform_5, window_bounds = array<i64: 64, 128>}]} {
    %c0 = arith.constant 0 : index
    %c0_0 = arith.constant 0 : index
    %0 = vector.load %arg1[%c0, %c0_0] : memref<64x64xf32, #tpu.memory_space<vmem>>, vector<64x64xf32>
    %c0_1 = arith.constant 0 : index
    %c0_2 = arith.constant 0 : index
    %1 = vector.load %arg3[%c0_1, %c0_2] : memref<32x16xf32, #tpu.memory_space<vmem>>, vector<32x16xf32>
    %c0_3 = arith.constant 0 : index
    %c0_4 = arith.constant 0 : index
    %2 = vector.load %arg4[%c0_3, %c0_4] : memref<8x32xf32, #tpu.memory_space<vmem>>, vector<8x32xf32>
    %c0_5 = arith.constant 0 : index
    %c0_6 = arith.constant 0 : index
    %3 = vector.load %arg5[%c0_5, %c0_6] : memref<128x8xf32, #tpu.memory_space<vmem>>, vector<128x8xf32>
    %c0_7 = arith.constant 0 : index
    %c0_8 = arith.constant 0 : index
    %4 = vector.load %arg2[%c0_7, %c0_8] : memref<64x16xf32, #tpu.memory_space<vmem>>, vector<64x16xf32>
    %cst = arith.constant dense<0.000000e+00> : vector<64x16xf32>
    %5 = tpu.matmul %0, %4, %cst {dimension_numbers = #tpu.dot_dimension_numbers<[1], [0], [0], [1], [0, 0, 1, 1], [], []>} : vector<64x64xf32>, vector<64x16xf32>, vector<64x16xf32> -> vector<64x16xf32>
    %cst_9 = arith.constant dense<0.000000e+00> : vector<64x32xf32>
    %6 = tpu.matmul %5, %1, %cst_9 {dimension_numbers = #tpu.dot_dimension_numbers<[1], [1], [0], [0], [0, 0, 1, 0], [], []>} : vector<64x16xf32>, vector<32x16xf32>, vector<64x32xf32> -> vector<64x32xf32>
    %cst_10 = arith.constant 0.000000e+00 : f32
    %7 = vector.broadcast %cst_10 : f32 to vector<64x32xf32>
    %8 = arith.maximumf %6, %7 : vector<64x32xf32>
    %cst_11 = arith.constant dense<0.000000e+00> : vector<64x32xf32>
    %9 = tpu.matmul %0, %8, %cst_11 {dimension_numbers = #tpu.dot_dimension_numbers<[1], [0], [0], [1], [0, 0, 1, 1], [], []>} : vector<64x64xf32>, vector<64x32xf32>, vector<64x32xf32> -> vector<64x32xf32>
    %cst_12 = arith.constant dense<0.000000e+00> : vector<64x8xf32>
    %10 = tpu.matmul %9, %2, %cst_12 {dimension_numbers = #tpu.dot_dimension_numbers<[1], [1], [0], [0], [0, 0, 1, 0], [], []>} : vector<64x32xf32>, vector<8x32xf32>, vector<64x8xf32> -> vector<64x8xf32>
    %cst_13 = arith.constant 0.000000e+00 : f32
    %11 = vector.broadcast %cst_13 : f32 to vector<64x8xf32>
    %12 = arith.maximumf %10, %11 : vector<64x8xf32>
    %cst_14 = arith.constant dense<0.000000e+00> : vector<64x8xf32>
    %13 = tpu.matmul %0, %12, %cst_14 {dimension_numbers = #tpu.dot_dimension_numbers<[1], [0], [0], [1], [0, 0, 1, 1], [], []>} : vector<64x64xf32>, vector<64x8xf32>, vector<64x8xf32> -> vector<64x8xf32>
    %cst_15 = arith.constant dense<0.000000e+00> : vector<64x128xf32>
    %14 = tpu.matmul %13, %3, %cst_15 {dimension_numbers = #tpu.dot_dimension_numbers<[1], [1], [0], [0], [0, 0, 1, 0], [], []>} : vector<64x8xf32>, vector<128x8xf32>, vector<64x128xf32> -> vector<64x128xf32>
    %c0_16 = arith.constant 0 : index
    %c0_17 = arith.constant 0 : index
    %15 = vector.load %arg6[%c0_16, %c0_17] : memref<64x128xf32, #tpu.memory_space<vmem>>, vector<64x128xf32>
    tpu.vector_store %arg6[%c0_16, %c0_17], %14 {strides = array<i32>} : memref<64x128xf32, #tpu.memory_space<vmem>>, vector<64x128xf32>,
    return
  }
  func.func @transform_0(%arg0: i32) -> (i32, i32) {
    %c0_i32 = arith.constant 0 : i32
    %c0_i32_0 = arith.constant 0 : i32
    %c0_i32_1 = arith.constant 0 : i32
    return %c0_i32, %c0_i32_0 : i32, i32
  }
  func.func @transform_1(%arg0: i32) -> (i32, i32) {
    %c0_i32 = arith.constant 0 : i32
    %c0_i32_0 = arith.constant 0 : i32
    %c0_i32_1 = arith.constant 0 : i32
    return %c0_i32, %c0_i32_0 : i32, i32
  }
  func.func @transform_2(%arg0: i32) -> (i32, i32) {
    %c0_i32 = arith.constant 0 : i32
    %c0_i32_0 = arith.constant 0 : i32
    %c0_i32_1 = arith.constant 0 : i32
    return %c0_i32, %c0_i32_0 : i32, i32
  }
  func.func @transform_3(%arg0: i32) -> (i32, i32) {
    %c0_i32 = arith.constant 0 : i32
    %c0_i32_0 = arith.constant 0 : i32
    %c0_i32_1 = arith.constant 0 : i32
    return %c0_i32, %c0_i32_0 : i32, i32
  }
  func.func @transform_4(%arg0: i32) -> (i32, i32) {
    %c0_i32 = arith.constant 0 : i32
    %c0_i32_0 = arith.constant 0 : i32
    %c0_i32_1 = arith.constant 0 : i32
    return %c0_i32, %c0_i32_0 : i32, i32
  }
  func.func @transform_5(%arg0: i32) -> (i32, i32) {
    %c0_i32 = arith.constant 0 : i32
    %c0_i32_0 = arith.constant 0 : i32
    %c0_i32_1 = arith.constant 0 : i32
    return %c0_i32, %c0_i32_0 : i32, i32
  }
}

</mosaic_0001>

<bundles_post_ra>
// kernel: gcn_forward.1
= control target key start
LH: loop header
LB: loop body
LE: loop exit
PB: predicated region body
PF: predicated region fallthrough
CT: control target
= control target key end

     0   :  { %vm57_vm0 = vcmask 523264   ;;  %vm187_vm1 = vcmask 130048   ;;  %vm442_vm3 = vcmask 261120   ;;  %vm688_vm4 = vcmask 64512   ;;  %s1617_s1 = inlined_call_operand.vmem [shape: f32[64,16], index: 1, kind: input, shape index: {}]   ;;  %s1618_s0 = inlined_call_operand.vmem [shape: f32[64,64], index: 0, kind: input, shape index: {}]   ;;  %s1619_s2 = inlined_call_operand.vmem [shape: f32[32,16], index: 2, kind: input, shape index: {}]   ;;  %s1620_s3 = inlined_call_operand.vmem [shape: f32[8,32], index: 3, kind: input, shape index: {}]   ;;  %s1621_s4 = inlined_call_operand.vmem [shape: f32[128,8], index: 4, kind: input, shape index: {}]   ;;  %s1622_s5 = inlined_call_operand.vmem [shape: f32[64,128], index: 5, kind: output, shape index: {}]  }
   0x1   :  { %v49_v0 = vld [vmem:[%s1617_s1] sm:$0xff]  ;;  %v50_v1 = vld [vmem:[%s1617_s1 + $0x8] sm:$0xff]  ;;  %v51_v2 = vld [vmem:[%s1617_s1 + $0x10] sm:$0xff] }
   0x2   :  { %v1202_v3 = vpack.c.bf16 %v50_v1, %v49_v0  ;;  %v52_v4 = vld [vmem:[%s1617_s1 + $0x18] sm:$0xff]  ;;  %v53_v6 = vld [vmem:[%s1617_s1 + $0x20] sm:$0xff]  ;;  %v54_v7 = vld [vmem:[%s1617_s1 + $0x28] sm:$0xff] }
   0x3   :  { %v1206_v5 = vpack.c.bf16 %v52_v4, %v51_v2  ;;  %v1361_v8 = vld [vmem:[%s1618_s0] sm:$0xff]  ;;  %v1210_v9 = vpack.c.bf16 %v54_v7, %v53_v6  ;;  %v55_v10 = vld [vmem:[%s1617_s1 + $0x30] sm:$0xff]  ;;  %v56_v11 = vld [vmem:[%s1617_s1 + $0x38] sm:$0xff] }
   0x4   :  { %1203 = vmatprep.subr.bf16.mxu0 %v1202_v3  ;;  %1056 = vmatprep.mubr.msk.f32.mxu0 %vm57_vm0, %v1361_v8  ;;  %v1214_v12 = vpack.c.bf16 %v56_v11, %v55_v10  ;;  %v28_v13 = vld [vmem:[%s1619_s2] sm:$0xff]  ;;  %v29_v14 = vld [vmem:[%s1619_s2 + $0x8] sm:$0xff]  ;;  %vm1379_vm2 = vmpackc.low %vm187_vm1, %vm187_vm1 }
   0x5   :  { %1205 = vmatpush3.bf16.msra.mxu0 %v1202_v3  ;;  %v1218_v15 = vpack.c.bf16 %v29_v14, %v28_v13  ;;  %v1386_v17 = vld [vmem:[%s1618_s0 + $0x8] sm:$0xff]  ;;  %v1391_v18 = vld [vmem:[%s1618_s0 + $0x10] sm:$0xff]  ;;  %v31_v20 = vld [vmem:[%s1619_s2 + $0x18] sm:$0xff] }
   0x6   :  { %1207 = vmatprep.subr.bf16.mxu0 %v1206_v5  ;;  %v30_v19 = vld [vmem:[%s1619_s2 + $0x10] sm:$0xff]  ;;  %v1408_v21 = vld [vmem:[%s1618_s0 + $0x18] sm:$0xff]  ;;  %v1413_v22 = vld [vmem:[%s1618_s0 + $0x20] sm:$0xff] }
   0x7   :  { %v1224_v23 = vpack.c.bf16 %v31_v20, %v30_v19  ;;  %v1422_v24 = vld [vmem:[%s1618_s0 + $0x28] sm:$0xff]  ;;  %v1427_v25 = vld [vmem:[%s1618_s0 + $0x30] sm:$0xff]  ;;  %v1440_v26 = vld [vmem:[%s1618_s0 + $0x38] sm:$0xff] }
   0x8   :  { %v32_v35 = vld [vmem:[%s1620_s3] sm:$0xff]  ;;  %v34_v1 = vld [vmem:[%s1621_s4 + $0x8] sm:$0xff]  ;;  %vm1493_vm5 = vmpackc.low %vm688_vm4, %vm688_vm4 }
   0x9   :  { %1209 = vmatpush3.bf16.msra.mxu0 %v1206_v5  ;;  %1116 = vmatprep.subr.msk.mxu1 %vm442_vm3, %v32_v35  ;;  %v33_v0 = vld [vmem:[%s1621_s4] sm:$0xff]  ;;  %v35_v4 = vld [vmem:[%s1621_s4 + $0x10] sm:$0xff]  ;;  %v36_v5 = vld [vmem:[%s1621_s4 + $0x18] sm:$0xff] }
   0xa   :  { %1211 = vmatprep.subr.bf16.mxu0 %v1210_v9  ;;  %1117 = vmatpush3.xpose.msk.msra.mxu1 %vm442_vm3, %v32_v35  ;;  %v1262_v3 = vpack.c.bf16 %v34_v1, %v33_v0  ;;  %v1268_v6 = vpack.c.bf16 %v36_v5, %v35_v4  ;;  %v37_v7 = vld [vmem:[%s1621_s4 + $0x20] sm:$0xff]  ;;  %v39_v10 = vld [vmem:[%s1621_s4 + $0x30] sm:$0xff]  ;;  %v40_v11 = vld [vmem:[%s1621_s4 + $0x38] sm:$0xff] }
   0xb   :  { %v41_v13 = vld [vmem:[%s1621_s4 + $0x40] sm:$0xff]  ;;  %v42_v14 = vld [vmem:[%s1621_s4 + $0x48] sm:$0xff]  ;;  %v43_v16 = vld [vmem:[%s1621_s4 + $0x50] sm:$0xff] }
   0xc   :  { %1264 = vmatprep.subr.msk.bf16.mxu1 %vm1493_vm5, %v1262_v3  ;;  %v44_v19 = vld [vmem:[%s1621_s4 + $0x58] sm:$0xff] }
   0xd   :  { %1213 = vmatpush3.bf16.msra.mxu0 %v1210_v9  ;;  %v1292_v20 = vpack.c.bf16 %v44_v19, %v43_v16 }
   0xe   :  { %1215 = vmatprep.subr.bf16.mxu0 %v1214_v12 }
  0x11   :  { %1217 = vmatpush3.bf16.msra.mxu0 %v1214_v12  ;;  %v1280_v12 = vpack.c.bf16 %v40_v11, %v39_v10 }
  0x12   :  { %1220 = vmatprep.subr.msk.bf16.mxu0 %vm1379_vm2, %v1218_v15 }
  0x14   :  { %1057 = vmatmul.mubr.msk.f32.vlgmr.msra.gmra.mrb[0].mxu0 %vm57_vm0, %v1386_v17 }
  0x15   :  { %1059 = vmatprep.mubr.msk.f32.mxu0 %vm57_vm0, %v1391_v18 }
  0x18   :  { %1060 = vmatmul.mubr.msk.f32.gmra.mrb[2].mxu0 %vm57_vm0, %v1408_v21 }
  0x19   :  { %1062 = vmatprep.mubr.msk.f32.mxu0 %vm57_vm0, %v1413_v22 }
  0x1a   :  { %1223 = vmatpush3.bf16.xpose.msk.msra.mxu0 %vm1379_vm2, %v1218_v15  ;;  %v1286_v15 = vpack.c.bf16 %v42_v14, %v41_v13 }
  0x1b   :  { %1226 = vmatprep.subr.msk.bf16.mxu0 %vm1379_vm2, %v1224_v23 }
  0x1c   :  { %1063 = vmatmul.mubr.msk.f32.gmra.mrb[4].mxu0 %vm57_vm0, %v1422_v24 }
  0x1d   :  { %1065 = vmatprep.mubr.msk.f32.mxu0 %vm57_vm0, %v1427_v25 }
  0x20   :  { %1066 = vmatmul.mubr.msk.f32.gmra.mrb[6].mxu0 %vm57_vm0, %v1440_v26 }
  0x22   :  { %1229 = vmatpush3.bf16.xpose.msk.msra.mxu0 %vm1379_vm2, %v1224_v23  ;;  %v45_v23 = vld [vmem:[%s1621_s4 + $0x60] sm:$0xff] }
  0xe7   :  { %v1058_v27 = vpop.f32.mrb[0].mxu0 }
  0xe8   :  { %v148_v28 = vpop.f32.mrb[1].mxu0 }
  0xe9   :  { %1076 = vmatprep.mubr.msk.f32.mxu0 %vm187_vm1, %v148_v28 }
  0xea   :  { %1077 = vmatmul.mubr.msk.f32.vlgmr.msra.gmra.mrb[8].mxu0 %vm187_vm1, %v1058_v27  ;;  %v46_v27 = vld [vmem:[%s1621_s4 + $0x68] sm:$0xff] }
  0xeb   :  { %v1061_v29 = vpop.f32.mrb[2].mxu0  ;;  %v1298_v28 = vpack.c.bf16 %v46_v27, %v45_v23 }
  0xec   :  { %v158_v30 = vpop.f32.mrb[3].mxu0 }
  0xed   :  { %1079 = vmatprep.mubr.msk.f32.mxu0 %vm187_vm1, %v158_v30  ;;  %v48_v30 = vld [vmem:[%s1621_s4 + $0x78] sm:$0xff] }
  0xee   :  { %1080 = vmatmul.mubr.msk.f32.gmra.mrb[10].mxu0 %vm187_vm1, %v1061_v29  ;;  %v47_v29 = vld [vmem:[%s1621_s4 + $0x70] sm:$0xff] }
  0xef   :  { %v1064_v31 = vpop.f32.mrb[4].mxu0 }
  0xf0   :  { %v168_v32 = vpop.f32.mrb[5].mxu0 }
  0xf1   :  { %1082 = vmatprep.mubr.msk.f32.mxu0 %vm187_vm1, %v168_v32 }
  0xf2   :  { %1083 = vmatmul.mubr.msk.f32.gmra.mrb[12].mxu0 %vm187_vm1, %v1064_v31  ;;  %v1304_v31 = vpack.c.bf16 %v48_v30, %v47_v29 }
  0xf3   :  { %v1067_v33 = vpop.f32.mrb[6].mxu0 }
  0xf4   :  { %v178_v34 = vpop.f32.mrb[7].mxu0 }
  0xf5   :  { %1085 = vmatprep.mubr.msk.f32.mxu0 %vm187_vm1, %v178_v34 }
  0xf6   :  { %1086 = vmatmul.mubr.msk.f32.gmra.mrb[14].mxu0 %vm187_vm1, %v1067_v33 }
  0xf7   :  { %1104 = vmatprep.mubr.msk.f32.mxu0 %vm57_vm0, %v1361_v8 }
 0x1bd   :  { %v1078_v36 = vpop.f32.mrb[8].mxu0 }
 0x1be   :  { %v330_v37 = vmax.f32 %v1078_v36, 0.0  ;;  %v290_v38 = vpop.f32.mrb[9].mxu0 }
 0x1bf   :  { %v329_v39 = vmax.f32 %v290_v38, 0.0 }
 0x1c1   :  { %v1230_v40 = vpack.c.bf16 %v330_v37, %v329_v39  ;;  %v1081_v41 = vpop.f32.mrb[10].mxu0 }
 0x1c2   :  { %v332_v42 = vmax.f32 %v1081_v41, 0.0  ;;  %v300_v43 = vpop.f32.mrb[11].mxu0 }
 0x1c3   :  { %v331_v44 = vmax.f32 %v300_v43, 0.0  ;;  %1231 = vmatprep.subr.bf16.mxu0 %v1230_v40 }
 0x1c4   :  { %1233 = vmatpush3.bf16.msra.mxu0 %v1230_v40 }
 0x1c5   :  { %v1234_v45 = vpack.c.bf16 %v332_v42, %v331_v44  ;;  %v1084_v46 = vpop.f32.mrb[12].mxu0 }
 0x1c6   :  { %v334_v47 = vmax.f32 %v1084_v46, 0.0  ;;  %v310_v48 = vpop.f32.mrb[13].mxu0 }
 0x1c7   :  { %v333_v49 = vmax.f32 %v310_v48, 0.0  ;;  %1235 = vmatprep.subr.bf16.mxu0 %v1234_v45 }
 0x1c8   :  { %1237 = vmatpush3.bf16.msra.mxu0 %v1234_v45 }
 0x1c9   :  { %v1238_v50 = vpack.c.bf16 %v334_v47, %v333_v49  ;;  %v1087_v51 = vpop.f32.mrb[14].mxu0 }
 0x1ca   :  { %v336_v52 = vmax.f32 %v1087_v51, 0.0  ;;  %v320_v53 = vpop.f32.mrb[15].mxu0 }
 0x1cb   :  { %v335_v54 = vmax.f32 %v320_v53, 0.0  ;;  %1239 = vmatprep.subr.bf16.mxu0 %v1238_v50 }
 0x1cc   :  { %1241 = vmatpush3.bf16.msra.mxu0 %v1238_v50 }
 0x1cd   :  { %v1242_v55 = vpack.c.bf16 %v336_v52, %v335_v54 }
 0x1cf   :  { %1243 = vmatprep.subr.bf16.mxu0 %v1242_v55 }
 0x1d0   :  { %1245 = vmatpush3.bf16.msra.mxu0 %v1242_v55 }
 0x1d3   :  { %1105 = vmatmul.mubr.msk.f32.vlgmr.msra.gmra.mrb[16].mxu0 %vm57_vm0, %v1386_v17 }
 0x1d4   :  { %1107 = vmatprep.mubr.msk.f32.mxu0 %vm57_vm0, %v1391_v18 }
 0x1d7   :  { %1108 = vmatmul.mubr.msk.f32.gmra.mrb[18].mxu0 %vm57_vm0, %v1408_v21 }
 0x1d8   :  { %1110 = vmatprep.mubr.msk.f32.mxu0 %vm57_vm0, %v1413_v22 }
 0x1db   :  { %1111 = vmatmul.mubr.msk.f32.gmra.mrb[20].mxu0 %vm57_vm0, %v1422_v24 }
 0x1dc   :  { %1113 = vmatprep.mubr.msk.f32.mxu0 %vm57_vm0, %v1427_v25 }
 0x1df   :  { %1114 = vmatmul.mubr.msk.f32.gmra.mrb[22].mxu0 %vm57_vm0, %v1440_v26 }
 0x1e0   :  { %1146 = vmatprep.mubr.msk.f32.mxu0 %vm57_vm0, %v1361_v8  ;;  %v38_v8 = vld [vmem:[%s1621_s4 + $0x28] sm:$0xff] }
 0x1e1   :  { %v1274_v9 = vpack.c.bf16 %v38_v8, %v37_v7 }
 0x2a6   :  { %v1106_v56 = vpop.f32.mrb[16].mxu0 }
 0x2a7   :  { %v403_v57 = vpop.f32.mrb[17].mxu0 }
 0x2a8   :  { %1118 = vmatprep.mubr.msk.f32.mxu1 %vm442_vm3, %v403_v57 }
 0x2a9   :  { %1119 = vmatmul.mubr.msk.f32.vlgmr.msra.gmra.mrb[0].mxu1 %vm442_vm3, %v1106_v56 }
 0x2aa   :  { %v1109_v58 = vpop.f32.mrb[18].mxu0  ;;  %1267 = vmatpush3.bf16.xpose.msk.msra.mxu1 %vm1493_vm5, %v1262_v3 }
 0x2ab   :  { %v413_v59 = vpop.f32.mrb[19].mxu0  ;;  %1270 = vmatprep.subr.msk.bf16.mxu1 %vm1493_vm5, %v1268_v6 }
 0x2ac   :  { %1121 = vmatprep.mubr.msk.f32.mxu1 %vm442_vm3, %v413_v59 }
 0x2ad   :  { %1122 = vmatmul.mubr.msk.f32.gmra.mrb[2].mxu1 %vm442_vm3, %v1109_v58 }
 0x2ae   :  { %v1112_v60 = vpop.f32.mrb[20].mxu0 }
 0x2af   :  { %v423_v61 = vpop.f32.mrb[21].mxu0 }
 0x2b0   :  { %1124 = vmatprep.mubr.msk.f32.mxu1 %vm442_vm3, %v423_v61 }
 0x2b1   :  { %1125 = vmatmul.mubr.msk.f32.gmra.mrb[4].mxu1 %vm442_vm3, %v1112_v60 }
 0x2b2   :  { %v1115_v62 = vpop.f32.mrb[22].mxu0  ;;  %1273 = vmatpush3.bf16.xpose.msk.msra.mxu1 %vm1493_vm5, %v1268_v6 }
 0x2b3   :  { %v433_v63 = vpop.f32.mrb[23].mxu0  ;;  %1276 = vmatprep.subr.msk.bf16.mxu1 %vm1493_vm5, %v1274_v9 }
 0x2b4   :  { %1127 = vmatprep.mubr.msk.f32.mxu1 %vm442_vm3, %v433_v63 }
 0x2b5   :  { %1128 = vmatmul.mubr.msk.f32.gmra.mrb[6].mxu1 %vm442_vm3, %v1115_v62 }
 0x2ba   :  { %1279 = vmatpush3.bf16.xpose.msk.msra.mxu1 %vm1493_vm5, %v1274_v9 }
 0x2bb   :  { %1282 = vmatprep.subr.msk.bf16.mxu1 %vm1493_vm5, %v1280_v12 }
 0x2c2   :  { %1285 = vmatpush3.bf16.xpose.msk.msra.mxu1 %vm1493_vm5, %v1280_v12 }
 0x2c3   :  { %1288 = vmatprep.subr.msk.bf16.mxu1 %vm1493_vm5, %v1286_v15 }
 0x2ca   :  { %1291 = vmatpush3.bf16.xpose.msk.msra.mxu1 %vm1493_vm5, %v1286_v15 }
 0x2cb   :  { %1294 = vmatprep.subr.msk.bf16.mxu1 %vm1493_vm5, %v1292_v20 }
 0x2d2   :  { %1297 = vmatpush3.bf16.xpose.msk.msra.mxu1 %vm1493_vm5, %v1292_v20 }
 0x2d3   :  { %1300 = vmatprep.subr.msk.bf16.mxu1 %vm1493_vm5, %v1298_v28 }
 0x2da   :  { %1303 = vmatpush3.bf16.xpose.msk.msra.mxu1 %vm1493_vm5, %v1298_v28 }
 0x2db   :  { %1306 = vmatprep.subr.msk.bf16.mxu1 %vm1493_vm5, %v1304_v31 }
 0x2e2   :  { %1309 = vmatpush3.bf16.xpose.msk.msra.mxu1 %vm1493_vm5, %v1304_v31 }
 0x37c   :  { %v1120_v32 = vpop.f32.mrb[0].mxu1 }
 0x37d   :  { %v576_v33 = vmax.f32 %v1120_v32, 0.0  ;;  %v536_v34 = vpop.f32.mrb[1].mxu1 }
 0x37e   :  { %v575_v35 = vmax.f32 %v536_v34, 0.0 }
 0x380   :  { %v1246_v36 = vpack.c.bf16 %v576_v33, %v575_v35  ;;  %v1123_v37 = vpop.f32.mrb[2].mxu1 }
 0x381   :  { %v578_v38 = vmax.f32 %v1123_v37, 0.0  ;;  %v546_v39 = vpop.f32.mrb[3].mxu1 }
 0x382   :  { %v577_v40 = vmax.f32 %v546_v39, 0.0  ;;  %1247 = vmatprep.subr.bf16.mxu0 %v1246_v36 }
 0x383   :  { %1249 = vmatpush3.bf16.msra.mxu0 %v1246_v36 }
 0x384   :  { %v1250_v41 = vpack.c.bf16 %v578_v38, %v577_v40  ;;  %v1126_v42 = vpop.f32.mrb[4].mxu1 }
 0x385   :  { %v580_v43 = vmax.f32 %v1126_v42, 0.0  ;;  %v556_v44 = vpop.f32.mrb[5].mxu1 }
 0x386   :  { %v579_v45 = vmax.f32 %v556_v44, 0.0  ;;  %1251 = vmatprep.subr.bf16.mxu0 %v1250_v41 }
 0x387   :  { %1253 = vmatpush3.bf16.msra.mxu0 %v1250_v41 }
 0x388   :  { %v1254_v46 = vpack.c.bf16 %v580_v43, %v579_v45  ;;  %v1129_v47 = vpop.f32.mrb[6].mxu1 }
 0x389   :  { %v582_v48 = vmax.f32 %v1129_v47, 0.0  ;;  %v566_v49 = vpop.f32.mrb[7].mxu1 }
 0x38a   :  { %v581_v50 = vmax.f32 %v566_v49, 0.0  ;;  %1255 = vmatprep.subr.bf16.mxu0 %v1254_v46 }
 0x38b   :  { %1257 = vmatpush3.bf16.msra.mxu0 %v1254_v46 }
 0x38c   :  { %v1258_v51 = vpack.c.bf16 %v582_v48, %v581_v50 }
 0x38e   :  { %1259 = vmatprep.subr.bf16.mxu0 %v1258_v51 }
 0x38f   :  { %1261 = vmatpush3.bf16.msra.mxu0 %v1258_v51 }
 0x392   :  { %1147 = vmatmul.mubr.msk.f32.vlgmr.msra.gmra.mrb[24].mxu0 %vm57_vm0, %v1386_v17 }
 0x393   :  { %1149 = vmatprep.mubr.msk.f32.mxu0 %vm57_vm0, %v1391_v18 }
 0x396   :  { %1150 = vmatmul.mubr.msk.f32.gmra.mrb[26].mxu0 %vm57_vm0, %v1408_v21 }
 0x397   :  { %1152 = vmatprep.mubr.msk.f32.mxu0 %vm57_vm0, %v1413_v22 }
 0x39a   :  { %1153 = vmatmul.mubr.msk.f32.gmra.mrb[28].mxu0 %vm57_vm0, %v1422_v24 }
 0x39b   :  { %1155 = vmatprep.mubr.msk.f32.mxu0 %vm57_vm0, %v1427_v25 }
 0x39e   :  { %1156 = vmatmul.mubr.msk.f32.gmra.mrb[30].mxu0 %vm57_vm0, %v1440_v26 }
 0x465   :  { %v1148_v52 = vpop.f32.mrb[24].mxu0 }
 0x466   :  { %v649_v17 = vpop.f32.mrb[25].mxu0 }
 0x467   :  { %1190 = vmatprep.mubr.msk.f32.mxu1 %vm688_vm4, %v649_v17 }
 0x468   :  { %1191 = vmatmul.mubr.msk.f32.vlgmr.msra.gmra.mrb[8].mxu1 %vm688_vm4, %v1148_v52 }
 0x469   :  { %v1151_v18 = vpop.f32.mrb[26].mxu0 }
 0x46a   :  { %v659_v21 = vpop.f32.mrb[27].mxu0 }
 0x46b   :  { %1193 = vmatprep.mubr.msk.f32.mxu1 %vm688_vm4, %v659_v21 }
 0x46c   :  { %1194 = vmatmul.mubr.msk.f32.gmra.mrb[10].mxu1 %vm688_vm4, %v1151_v18 }
 0x46d   :  { %v1154_v22 = vpop.f32.mrb[28].mxu0 }
 0x46e   :  { %v669_v24 = vpop.f32.mrb[29].mxu0 }
 0x46f   :  { %1196 = vmatprep.mubr.msk.f32.mxu1 %vm688_vm4, %v669_v24 }
 0x470   :  { %1197 = vmatmul.mubr.msk.f32.gmra.mrb[12].mxu1 %vm688_vm4, %v1154_v22 }
 0x471   :  { %v1157_v25 = vpop.f32.mrb[30].mxu0 }
 0x472   :  { %v679_v26 = vpop.f32.mrb[31].mxu0 }
 0x473   :  { %1199 = vmatprep.mubr.msk.f32.mxu1 %vm688_vm4, %v679_v26 }
 0x474   :  { %1200 = vmatmul.mubr.msk.f32.gmra.mrb[14].mxu1 %vm688_vm4, %v1157_v25 }
 0x53b   :  { %v1192_v53 = vpop.f32.mrb[8].mxu1 }
 0x53c   :  { %867 = vst [vmem:[%s1622_s5 + $0x8] sm:$0xff] %v1192_v53  ;;  %v827_v54 = vpop.f32.mrb[9].mxu1 }
 0x53d   :  { %866 = vst [vmem:[%s1622_s5] sm:$0xff] %v827_v54 }
 0x53f   :  { %v1195_v55 = vpop.f32.mrb[10].mxu1 }
 0x540   :  { %869 = vst [vmem:[%s1622_s5 + $0x18] sm:$0xff] %v1195_v55  ;;  %v837_v56 = vpop.f32.mrb[11].mxu1 }
 0x541   :  { %868 = vst [vmem:[%s1622_s5 + $0x10] sm:$0xff] %v837_v56 }
 0x543   :  { %v1198_v57 = vpop.f32.mrb[12].mxu1 }
 0x544   :  { %871 = vst [vmem:[%s1622_s5 + $0x28] sm:$0xff] %v1198_v57  ;;  %v847_v58 = vpop.f32.mrb[13].mxu1 }
 0x545   :  { %870 = vst [vmem:[%s1622_s5 + $0x20] sm:$0xff] %v847_v58 }
 0x547   :  { %v1201_v59 = vpop.f32.mrb[14].mxu1 }
 0x548   :  { %873 = vst [vmem:[%s1622_s5 + $0x38] sm:$0xff] %v1201_v59  ;;  %v857_v60 = vpop.f32.mrb[15].mxu1 }
 0x549   :  { %872 = vst [vmem:[%s1622_s5 + $0x30] sm:$0xff] %v857_v60 }

</bundles_post_ra>
